<compile_context>
chip_gen: v7x
topology: tpu7x:2x2x1
jax: 0.10.0
libtpu: 0.0.40
codegen_flags: <defaults>
</compile_context>

<pallas_src>
import functools

import jax
import jax.numpy as jnp
from jax.experimental import pallas as pl
from jax.experimental.pallas import tpu as pltpu


def _softplus(x):
    # Numerically-stable softplus: log(1 + exp(x)) = max(x, 0) + log(1 + exp(-|x|)).
    return jnp.maximum(x, 0.0) + jnp.log(1.0 + jnp.exp(-jnp.abs(x)))


def _make_rcml_kernel(num_views: int, num_layers: int, layer_in_dims, batch: int):
    """Fused kernel: V views, each an L-layer MLP with per-view weights.

    Kernel ref layout (all whole-array VMEM blocks, no grid):
      x_ref                : (V, B, Dpad)
      wb_refs (L refs)     : per layer l: (V, d_in_l + B, d_out_l)  where
                             rows [0 : d_in_l]         = W^T   (d_in_l, d_out_l)
                             rows [d_in_l : d_in_l+B]  = bias replicated over batch
      out_ref              : (V+1, B, Cpad)  -- slot v < V holds evidences[v],
                                               slot V holds evidence_a
    """

    def kernel(x_ref, *refs):
        wb_refs = refs[:num_layers]
        out_ref = refs[num_layers]

        eva = None
        for v in range(num_views):                       # static unroll, V is tiny
            h = x_ref[v]                                 # (B, Dpad), f32
            for l in range(num_layers):
                d_in = layer_in_dims[l]
                wb = wb_refs[l]
                wT = wb[v, :d_in, :]                     # (d_in, d_out)  sublane-aligned
                b = wb[v, d_in:d_in + batch, :]          # (B, d_out)     plain vreg add
                z = jnp.dot(h, wT, preferred_element_type=jnp.float32) + b
                if l < num_layers - 1:
                    h = jnp.maximum(z, 0.0)              # ReLU
                else:
                    h = _softplus(z)                     # Softplus (final layer)
            out_ref[v] = h
            # evidence_a running average, exactly as in the PyTorch loop
            eva = h if v == 0 else (h + eva) * 0.5
        out_ref[num_views] = eva

    return kernel


def prepare_rcml_params(layer_params, num_classes, batch, d_pad=128):
    """One-time parameter prep (hoisted out of the per-call forward).

    layer_params : list over layers of (W_all, b_all) with PyTorch layout
                   W_all: (V, d_out, d_in), b_all: (V, d_out).
    Returns (packed_slabs, layer_in_dims, Cpad).
    """
    L = len(layer_params)
    C = num_classes
    Cpad = max(128, ((C + 127) // 128) * 128)            # lane-dense output width

    packed, layer_in_dims = [], []
    prev_out = None
    V0 = layer_params[0][0].shape[0]
    for l, (W, b) in enumerate(layer_params):
        W = jnp.asarray(W, jnp.float32)                  # (V, d_out, d_in)
        b = jnp.asarray(b, jnp.float32)                  # (V, d_out)
        V, d_out, d_in = W.shape
        # All views must share identical layer dims for the stacked layout to be valid.
        assert V == V0, "all layers must stack the same number of views"
        assert prev_out is None or d_in == prev_out, "per-view dims must be identical across views"
        prev_out = d_out

        WT = jnp.transpose(W, (0, 2, 1))                 # (V, d_in, d_out)
        if l == 0 and d_in < d_pad:                      # lane-dense contraction dim
            WT = jnp.pad(WT, ((0, 0), (0, d_pad - d_in), (0, 0)))
            d_in = d_pad
        if l == L - 1 and d_out < Cpad:                  # lane-dense output dim
            WT = jnp.pad(WT, ((0, 0), (0, 0), (0, Cpad - d_out)))
            b = jnp.pad(b, ((0, 0), (0, Cpad - d_out)))
            d_out = Cpad

        # Fold bias into the weight slab (replicated over batch rows).
        b_rep = jnp.broadcast_to(b[:, None, :], (V, batch, d_out))
        wb = jnp.concatenate([WT, b_rep], axis=1)        # (V, d_in + B, d_out)
        packed.append(wb)
        layer_in_dims.append(d_in)
    return packed, tuple(layer_in_dims), Cpad


def make_origin_rcml_forward(layer_params, num_classes, num_views, batch, in_dim):
    """Builds a jitted forward closed over the (one-time prepared) parameters."""
    packed, layer_in_dims, Cpad = prepare_rcml_params(layer_params, num_classes, batch)
    L = len(packed)
    Dpad = layer_in_dims[0]
    kernel = _make_rcml_kernel(num_views, L, layer_in_dims, batch)

    @jax.jit
    def forward(X):
        # X: (V, B, D) f32.  Pad the contracting dim to Dpad (lane-dense LHS loads).
        x = jnp.asarray(X, jnp.float32)
        if in_dim < Dpad:
            x = jnp.pad(x, ((0, 0), (0, 0), (0, Dpad - in_dim)))

        out = pl.pallas_call(
            kernel,
            out_shape=jax.ShapeDtypeStruct((num_views + 1, batch, Cpad), jnp.float32),
            in_specs=[pl.BlockSpec(memory_space=pltpu.MemorySpace.VMEM)] * (1 + L),
            out_specs=pl.BlockSpec(memory_space=pltpu.MemorySpace.VMEM),
        )(x, *packed)

        # Single slice of the padded slab; evidence_a lives in slot V.
        ev_all = out[:num_views, :, :num_classes]        # (V, B, C)
        evidence_a = out[num_views, :, :num_classes]     # (B, C)
        return ev_all, evidence_a

    def forward_with_dict(X):
        ev_all, evidence_a = forward(X)
        evidences = {v: ev_all[v] for v in range(num_views)}
        return evidences, evidence_a

    return forward_with_dict


def _init_linear(key, out_features, in_features):
    # Deterministic init mimicking nn.Linear's default (uniform in +-1/sqrt(fan_in)).
    kw, kb = jax.random.split(key)
    bound = 1.0 / jnp.sqrt(jnp.float32(in_features))
    W = jax.random.uniform(kw, (out_features, in_features), jnp.float32, -bound, bound)
    b = jax.random.uniform(kb, (out_features,), jnp.float32, -bound, bound)
    return W, b


if __name__ == "__main__":
    key = jax.random.PRNGKey(0)

    # Small shapes consistent with the module: num_views views, each X[v] is (batch, in_dim),
    # per-view EvidenceCollector with dims[v] = [in_dim, hidden] then num_classes + Softplus.
    num_views = 3
    batch = 8
    in_dim = 32
    hidden = 128
    num_classes = 10
    layer_dims = [in_dim, hidden, num_classes]

    k_x, k_w = jax.random.split(key)
    X = jax.random.normal(k_x, (num_views, batch, in_dim), jnp.float32)

    # Per-view, per-layer weights (stacked along the view axis).
    layer_params = []
    for l in range(len(layer_dims) - 1):
        Ws, bs = [], []
        for v in range(num_views):
            kv = jax.random.fold_in(k_w, v * 97 + l)
            W, b = _init_linear(kv, layer_dims[l + 1], layer_dims[l])
            Ws.append(W)
            bs.append(b)
        layer_params.append((jnp.stack(Ws), jnp.stack(bs)))

    # One-time prep + jitted forward (params constant-folded / closed over).
    rcml_forward = make_origin_rcml_forward(layer_params, num_classes, num_views, batch, in_dim)

    evidences, evidence_a = rcml_forward(X)
    jax.block_until_ready(evidence_a)
    for v in evidences:
        jax.block_until_ready(evidences[v])

    # Reference in plain JAX (same math, no Pallas, original unpacked params).
    ref_ev = []
    for v in range(num_views):
        h = X[v]
        for l, (W, b) in enumerate(layer_params):
            z = h @ W[v].T + b[v]
            h = jnp.maximum(z, 0.0) if l < len(layer_params) - 1 else _softplus(z)
        ref_ev.append(h)
    ref_a = ref_ev[0]
    for v in range(1, num_views):
        ref_a = (ref_ev[v] + ref_a) / 2

    for v in range(num_views):
        assert jnp.allclose(evidences[v], ref_ev[v], atol=2e-4, rtol=2e-4), f"view {v} mismatch"
    assert jnp.allclose(evidence_a, ref_a, atol=2e-4, rtol=2e-4), "evidence_a mismatch"

    print("KERNEL_OK")
</pallas_src>

<mosaic_0001>
module attributes {stable_mosaic.version = 11 : i64} {
  func.func @kernel(%arg0: memref<3x8x128xf32, #tpu.memory_space<vmem>>, %arg1: memref<3x136x128xf32, #tpu.memory_space<vmem>>, %arg2: memref<3x136x128xf32, #tpu.memory_space<vmem>>, %arg3: memref<4x8x128xf32, #tpu.memory_space<vmem>>) attributes {dimension_semantics = [], scalar_prefetch = 0 : i64, scratch_operands = 0 : i64, tpu.core_type = #tpu.core_type<tc>} {
    %c0 = arith.constant 0 : index
    %c0_0 = arith.constant 0 : index
    %c0_1 = arith.constant 0 : index
    %0 = vector.load %arg0[%c0, %c0_0, %c0_1] : memref<3x8x128xf32, #tpu.memory_space<vmem>>, vector<1x8x128xf32>
    %1 = vector.shape_cast %0 : vector<1x8x128xf32> to vector<8x128xf32>
    %c0_2 = arith.constant 0 : index
    %c0_3 = arith.constant 0 : index
    %c0_4 = arith.constant 0 : index
    %2 = vector.load %arg1[%c0_2, %c0_3, %c0_4] : memref<3x136x128xf32, #tpu.memory_space<vmem>>, vector<1x128x128xf32>
    %3 = vector.shape_cast %2 : vector<1x128x128xf32> to vector<128x128xf32>
    %c0_5 = arith.constant 0 : index
    %c128 = arith.constant 128 : index
    %c0_6 = arith.constant 0 : index
    %4 = vector.load %arg1[%c0_5, %c128, %c0_6] : memref<3x136x128xf32, #tpu.memory_space<vmem>>, vector<1x8x128xf32>
    %5 = vector.shape_cast %4 : vector<1x8x128xf32> to vector<8x128xf32>
    %cst = arith.constant dense<0.000000e+00> : vector<8x128xf32>
    %6 = tpu.matmul %1, %3, %cst {dimension_numbers = #tpu.dot_dimension_numbers<[1], [0], [0], [1], [0, 0, 1, 1], [], []>} : vector<8x128xf32>, vector<128x128xf32>, vector<8x128xf32> -> vector<8x128xf32>
    %7 = arith.addf %6, %5 : vector<8x128xf32>
    %cst_7 = arith.constant 0.000000e+00 : f32
    %8 = vector.broadcast %cst_7 : f32 to vector<8x128xf32>
    %9 = arith.maximumf %7, %8 : vector<8x128xf32>
    %c0_8 = arith.constant 0 : index
    %c0_9 = arith.constant 0 : index
    %c0_10 = arith.constant 0 : index
    %10 = vector.load %arg2[%c0_8, %c0_9, %c0_10] : memref<3x136x128xf32, #tpu.memory_space<vmem>>, vector<1x128x128xf32>
    %11 = vector.shape_cast %10 : vector<1x128x128xf32> to vector<128x128xf32>
    %c0_11 = arith.constant 0 : index
    %c128_12 = arith.constant 128 : index
    %c0_13 = arith.constant 0 : index
    %12 = vector.load %arg2[%c0_11, %c128_12, %c0_13] : memref<3x136x128xf32, #tpu.memory_space<vmem>>, vector<1x8x128xf32>
    %13 = vector.shape_cast %12 : vector<1x8x128xf32> to vector<8x128xf32>
    %cst_14 = arith.constant dense<0.000000e+00> : vector<8x128xf32>
    %14 = tpu.matmul %9, %11, %cst_14 {dimension_numbers = #tpu.dot_dimension_numbers<[1], [0], [0], [1], [0, 0, 1, 1], [], []>} : vector<8x128xf32>, vector<128x128xf32>, vector<8x128xf32> -> vector<8x128xf32>
    %15 = arith.addf %14, %13 : vector<8x128xf32>
    %cst_15 = arith.constant 0.000000e+00 : f32
    %16 = vector.broadcast %cst_15 : f32 to vector<8x128xf32>
    %17 = arith.maximumf %15, %16 : vector<8x128xf32>
    %18 = math.absf %15 : vector<8x128xf32>
    %cst_16 = arith.constant 0.000000e+00 : f32
    %19 = vector.broadcast %cst_16 : f32 to vector<8x128xf32>
    %20 = arith.subf %19, %18 : vector<8x128xf32>
    %21 = math.exp %20 : vector<8x128xf32>
    %cst_17 = arith.constant 1.000000e+00 : f32
    %22 = vector.broadcast %cst_17 : f32 to vector<8x128xf32>
    %23 = arith.addf %22, %21 : vector<8x128xf32>
    %24 = math.log %23 : vector<8x128xf32>
    %25 = arith.addf %17, %24 : vector<8x128xf32>
    %c0_18 = arith.constant 0 : index
    %c0_19 = arith.constant 0 : index
    %c0_20 = arith.constant 0 : index
    %26 = vector.load %arg3[%c0_18, %c0_19, %c0_20] : memref<4x8x128xf32, #tpu.memory_space<vmem>>, vector<1x8x128xf32>
    %27 = vector.shape_cast %26 : vector<1x8x128xf32> to vector<8x128xf32>
    %28 = vector.shape_cast %25 : vector<8x128xf32> to vector<1x8x128xf32>
    tpu.vector_store %arg3[%c0_18, %c0_19, %c0_20], %28 {strides = array<i32>} : memref<4x8x128xf32, #tpu.memory_space<vmem>>, vector<1x8x128xf32>,
    %c1 = arith.constant 1 : index
    %c0_21 = arith.constant 0 : index
    %c0_22 = arith.constant 0 : index
    %29 = vector.load %arg0[%c1, %c0_21, %c0_22] : memref<3x8x128xf32, #tpu.memory_space<vmem>>, vector<1x8x128xf32>
    %30 = vector.shape_cast %29 : vector<1x8x128xf32> to vector<8x128xf32>
    %c1_23 = arith.constant 1 : index
    %c0_24 = arith.constant 0 : index
    %c0_25 = arith.constant 0 : index
    %31 = vector.load %arg1[%c1_23, %c0_24, %c0_25] : memref<3x136x128xf32, #tpu.memory_space<vmem>>, vector<1x128x128xf32>
    %32 = vector.shape_cast %31 : vector<1x128x128xf32> to vector<128x128xf32>
    %c1_26 = arith.constant 1 : index
    %c128_27 = arith.constant 128 : index
    %c0_28 = arith.constant 0 : index
    %33 = vector.load %arg1[%c1_26, %c128_27, %c0_28] : memref<3x136x128xf32, #tpu.memory_space<vmem>>, vector<1x8x128xf32>
    %34 = vector.shape_cast %33 : vector<1x8x128xf32> to vector<8x128xf32>
    %cst_29 = arith.constant dense<0.000000e+00> : vector<8x128xf32>
    %35 = tpu.matmul %30, %32, %cst_29 {dimension_numbers = #tpu.dot_dimension_numbers<[1], [0], [0], [1], [0, 0, 1, 1], [], []>} : vector<8x128xf32>, vector<128x128xf32>, vector<8x128xf32> -> vector<8x128xf32>
    %36 = arith.addf %35, %34 : vector<8x128xf32>
    %cst_30 = arith.constant 0.000000e+00 : f32
    %37 = vector.broadcast %cst_30 : f32 to vector<8x128xf32>
    %38 = arith.maximumf %36, %37 : vector<8x128xf32>
    %c1_31 = arith.constant 1 : index
    %c0_32 = arith.constant 0 : index
    %c0_33 = arith.constant 0 : index
    %39 = vector.load %arg2[%c1_31, %c0_32, %c0_33] : memref<3x136x128xf32, #tpu.memory_space<vmem>>, vector<1x128x128xf32>
    %40 = vector.shape_cast %39 : vector<1x128x128xf32> to vector<128x128xf32>
    %c1_34 = arith.constant 1 : index
    %c128_35 = arith.constant 128 : index
    %c0_36 = arith.constant 0 : index
    %41 = vector.load %arg2[%c1_34, %c128_35, %c0_36] : memref<3x136x128xf32, #tpu.memory_space<vmem>>, vector<1x8x128xf32>
    %42 = vector.shape_cast %41 : vector<1x8x128xf32> to vector<8x128xf32>
    %cst_37 = arith.constant dense<0.000000e+00> : vector<8x128xf32>
    %43 = tpu.matmul %38, %40, %cst_37 {dimension_numbers = #tpu.dot_dimension_numbers<[1], [0], [0], [1], [0, 0, 1, 1], [], []>} : vector<8x128xf32>, vector<128x128xf32>, vector<8x128xf32> -> vector<8x128xf32>
    %44 = arith.addf %43, %42 : vector<8x128xf32>
    %cst_38 = arith.constant 0.000000e+00 : f32
    %45 = vector.broadcast %cst_38 : f32 to vector<8x128xf32>
    %46 = arith.maximumf %44, %45 : vector<8x128xf32>
    %47 = math.absf %44 : vector<8x128xf32>
    %cst_39 = arith.constant 0.000000e+00 : f32
    %48 = vector.broadcast %cst_39 : f32 to vector<8x128xf32>
    %49 = arith.subf %48, %47 : vector<8x128xf32>
    %50 = math.exp %49 : vector<8x128xf32>
    %cst_40 = arith.constant 1.000000e+00 : f32
    %51 = vector.broadcast %cst_40 : f32 to vector<8x128xf32>
    %52 = arith.addf %51, %50 : vector<8x128xf32>
    %53 = math.log %52 : vector<8x128xf32>
    %54 = arith.addf %46, %53 : vector<8x128xf32>
    %c1_41 = arith.constant 1 : index
    %c0_42 = arith.constant 0 : index
    %c0_43 = arith.constant 0 : index
    %55 = vector.load %arg3[%c1_41, %c0_42, %c0_43] : memref<4x8x128xf32, #tpu.memory_space<vmem>>, vector<1x8x128xf32>
    %56 = vector.shape_cast %55 : vector<1x8x128xf32> to vector<8x128xf32>
    %57 = vector.shape_cast %54 : vector<8x128xf32> to vector<1x8x128xf32>
    tpu.vector_store %arg3[%c1_41, %c0_42, %c0_43], %57 {strides = array<i32>} : memref<4x8x128xf32, #tpu.memory_space<vmem>>, vector<1x8x128xf32>,
    %58 = arith.addf %54, %25 : vector<8x128xf32>
    %cst_44 = arith.constant 5.000000e-01 : f32
    %59 = vector.broadcast %cst_44 : f32 to vector<8x128xf32>
    %60 = arith.mulf %58, %59 : vector<8x128xf32>
    %c2 = arith.constant 2 : index
    %c0_45 = arith.constant 0 : index
    %c0_46 = arith.constant 0 : index
    %61 = vector.load %arg0[%c2, %c0_45, %c0_46] : memref<3x8x128xf32, #tpu.memory_space<vmem>>, vector<1x8x128xf32>
    %62 = vector.shape_cast %61 : vector<1x8x128xf32> to vector<8x128xf32>
    %c2_47 = arith.constant 2 : index
    %c0_48 = arith.constant 0 : index
    %c0_49 = arith.constant 0 : index
    %63 = vector.load %arg1[%c2_47, %c0_48, %c0_49] : memref<3x136x128xf32, #tpu.memory_space<vmem>>, vector<1x128x128xf32>
    %64 = vector.shape_cast %63 : vector<1x128x128xf32> to vector<128x128xf32>
    %c2_50 = arith.constant 2 : index
    %c128_51 = arith.constant 128 : index
    %c0_52 = arith.constant 0 : index
    %65 = vector.load %arg1[%c2_50, %c128_51, %c0_52] : memref<3x136x128xf32, #tpu.memory_space<vmem>>, vector<1x8x128xf32>
    %66 = vector.shape_cast %65 : vector<1x8x128xf32> to vector<8x128xf32>
    %cst_53 = arith.constant dense<0.000000e+00> : vector<8x128xf32>
    %67 = tpu.matmul %62, %64, %cst_53 {dimension_numbers = #tpu.dot_dimension_numbers<[1], [0], [0], [1], [0, 0, 1, 1], [], []>} : vector<8x128xf32>, vector<128x128xf32>, vector<8x128xf32> -> vector<8x128xf32>
    %68 = arith.addf %67, %66 : vector<8x128xf32>
    %cst_54 = arith.constant 0.000000e+00 : f32
    %69 = vector.broadcast %cst_54 : f32 to vector<8x128xf32>
    %70 = arith.maximumf %68, %69 : vector<8x128xf32>
    %c2_55 = arith.constant 2 : index
    %c0_56 = arith.constant 0 : index
    %c0_57 = arith.constant 0 : index
    %71 = vector.load %arg2[%c2_55, %c0_56, %c0_57] : memref<3x136x128xf32, #tpu.memory_space<vmem>>, vector<1x128x128xf32>
    %72 = vector.shape_cast %71 : vector<1x128x128xf32> to vector<128x128xf32>
    %c2_58 = arith.constant 2 : index
    %c128_59 = arith.constant 128 : index
    %c0_60 = arith.constant 0 : index
    %73 = vector.load %arg2[%c2_58, %c128_59, %c0_60] : memref<3x136x128xf32, #tpu.memory_space<vmem>>, vector<1x8x128xf32>
    %74 = vector.shape_cast %73 : vector<1x8x128xf32> to vector<8x128xf32>
    %cst_61 = arith.constant dense<0.000000e+00> : vector<8x128xf32>
    %75 = tpu.matmul %70, %72, %cst_61 {dimension_numbers = #tpu.dot_dimension_numbers<[1], [0], [0], [1], [0, 0, 1, 1], [], []>} : vector<8x128xf32>, vector<128x128xf32>, vector<8x128xf32> -> vector<8x128xf32>
    %76 = arith.addf %75, %74 : vector<8x128xf32>
    %cst_62 = arith.constant 0.000000e+00 : f32
    %77 = vector.broadcast %cst_62 : f32 to vector<8x128xf32>
    %78 = arith.maximumf %76, %77 : vector<8x128xf32>
    %79 = math.absf %76 : vector<8x128xf32>
    %cst_63 = arith.constant 0.000000e+00 : f32
    %80 = vector.broadcast %cst_63 : f32 to vector<8x128xf32>
    %81 = arith.subf %80, %79 : vector<8x128xf32>
    %82 = math.exp %81 : vector<8x128xf32>
    %cst_64 = arith.constant 1.000000e+00 : f32
    %83 = vector.broadcast %cst_64 : f32 to vector<8x128xf32>
    %84 = arith.addf %83, %82 : vector<8x128xf32>
    %85 = math.log %84 : vector<8x128xf32>
    %86 = arith.addf %78, %85 : vector<8x128xf32>
    %c2_65 = arith.constant 2 : index
    %c0_66 = arith.constant 0 : index
    %c0_67 = arith.constant 0 : index
    %87 = vector.load %arg3[%c2_65, %c0_66, %c0_67] : memref<4x8x128xf32, #tpu.memory_space<vmem>>, vector<1x8x128xf32>
    %88 = vector.shape_cast %87 : vector<1x8x128xf32> to vector<8x128xf32>
    %89 = vector.shape_cast %86 : vector<8x128xf32> to vector<1x8x128xf32>
    tpu.vector_store %arg3[%c2_65, %c0_66, %c0_67], %89 {strides = array<i32>} : memref<4x8x128xf32, #tpu.memory_space<vmem>>, vector<1x8x128xf32>,
    %90 = arith.addf %86, %60 : vector<8x128xf32>
    %cst_68 = arith.constant 5.000000e-01 : f32
    %91 = vector.broadcast %cst_68 : f32 to vector<8x128xf32>
    %92 = arith.mulf %90, %91 : vector<8x128xf32>
    %c3 = arith.constant 3 : index
    %c0_69 = arith.constant 0 : index
    %c0_70 = arith.constant 0 : index
    %93 = vector.load %arg3[%c3, %c0_69, %c0_70] : memref<4x8x128xf32, #tpu.memory_space<vmem>>, vector<1x8x128xf32>
    %94 = vector.shape_cast %93 : vector<1x8x128xf32> to vector<8x128xf32>
    %95 = vector.shape_cast %92 : vector<8x128xf32> to vector<1x8x128xf32>
    tpu.vector_store %arg3[%c3, %c0_69, %c0_70], %95 {strides = array<i32>} : memref<4x8x128xf32, #tpu.memory_space<vmem>>, vector<1x8x128xf32>,
    return
  }
}

</mosaic_0001>

<bundles_post_ra>
// kernel: forward.1
= control target key start
LH: loop header
LB: loop body
LE: loop exit
PB: predicated region body
PF: predicated region fallthrough
CT: control target
= control target key end

     0   :  { %8 = vsyncpa [#allocation3], 0  ;;  %s1280_s0 = inlined_call_operand.vmem [shape: f32[3,8,128], index: 0, kind: input, shape index: {}]   ;;  %s1281_s1 = inlined_call_operand.hbm [shape: f32[3,136,128], index: 1, kind: input, shape index: {}]   ;;  %s1282_s2 = inlined_call_operand.hbm [shape: f32[3,136,128], index: 2, kind: input, shape index: {}]   ;;  %s1283_s3 = inlined_call_operand.vmem [shape: f32[4,8,128], index: 3, kind: output, shape index: {}]  }
   0x1   :  { %9 = vsyncpa [#allocation5], 0  ;;  %s1148_s12 = smov [#allocation2]   ;;  %s1100_s16 = scalar_lea.hbm %s1281_s1, 6528 }
   0x2   :  { %s17_s13 = sshll.u32 %s1148_s12, 4  ;;  %p1101_p0 = scmp.ne.s32.totalorder %s1281_s1, %s1100_s16  ;;  %s18_s13 = int_to_ptr.vmem [resolvable:$true] %s17_s13 }
   0x3   :  { %p1104_p1 = scmp.lt.u32.totalorder %s1100_s16, %s1281_s1 }
   0x5   :  { %p1106_p2 = pnand %p1104_p1, %p1101_p0 }
   0x7   :  { %1109 = shalt.err (!%p1106_p2)
}
   0x8   :  { %s1110_s21 = scalar_lea.vmem %s18_s13, 6528  ;;  %p1115_p4 = scmp.lt.s32.totalorder %s18_s13, %s18_s13 }
   0x9   :  { %p1111_p3 = scmp.ne.s32.totalorder %s18_s13, %s1110_s21  ;;  %p1116_p5 = scmp.lt.s32.totalorder %s1110_s21, %s1110_s21 }
   0xb   :  { %p1117_p6 = por %p1116_p5, %p1115_p4 }
   0xd   :  { %p1118_p7 = pnand %p1117_p6, %p1111_p3 }
   0xf   :  { %1121 = shalt.err (!%p1118_p7)
}
  0x10   :  { %s1149_s22 = smov 128   ;;  %s1150_s23 = smov 8  }
  0x11   :  { %23 = dma.hbm_to_vmem [thread:$0]  %s1281_s1, 6528, %s18_s13, [#allocation3], %s1149_s22, %s1149_s22, %s1150_s23  }
  0x12   :  { %s1151_s26 = smov [#allocation4]   ;;  %s1122_s30 = scalar_lea.hbm %s1282_s2, 6528 }
  0x13   :  { %s29_s27 = sshll.u32 %s1151_s26, 4  ;;  %p1123_p8 = scmp.ne.s32.totalorder %s1282_s2, %s1122_s30  ;;  %s30_s27 = int_to_ptr.vmem [resolvable:$true] %s29_s27 }
  0x14   :  { %p1126_p9 = scmp.lt.u32.totalorder %s1122_s30, %s1282_s2 }
  0x16   :  { %p1128_p10 = pnand %p1126_p9, %p1123_p8 }
  0x18   :  { %1131 = shalt.err (!%p1128_p10)
}
  0x19   :  { %s1132_s8 = scalar_lea.vmem %s30_s27, 6528  ;;  %p1137_p12 = scmp.lt.s32.totalorder %s30_s27, %s30_s27 }
  0x1a   :  { %p1133_p11 = scmp.ne.s32.totalorder %s30_s27, %s1132_s8  ;;  %p1138_p13 = scmp.lt.s32.totalorder %s1132_s8, %s1132_s8 }
  0x1c   :  { %p1139_p0 = por %p1138_p13, %p1137_p12 }
  0x1e   :  { %p1140_p1 = pnand %p1139_p0, %p1133_p11 }
  0x20   :  { %1143 = shalt.err (!%p1140_p1)
}
  0x21   :  { %35 = dma.hbm_to_vmem [thread:$0]  %s1282_s2, 6528, %s30_s27, [#allocation5], %s1149_s22, %s1149_s22, %s1150_s23  }
  0x22   :  { %1144 = dma.done.wait [#allocation3], 6528  }
  0x23   :  { %1145 = vsyncadd [#allocation3], 4294960768 }
  0x24   :  { %1146 = dma.done.wait [#allocation5], 6528  }
  0x25   :  { %1147 = vsyncadd [#allocation5], 4294960768  ;;  %v1152_v0 = vmov 0.0|0.0   ;;  %vm1153_vm0 = vmmov 0   ;;  %v1154_v1 = vmov 0.0   ;;  %v43_v2 = vld [vmem:[#allocation2] sm:$0xff] }
  0x26   :  { %937 = vmatprep.subr.bf16.mxu0 %v1152_v0  ;;  %759 = vmatprep.mubr.msk.f32.mxu0 %vm1153_vm0, %v1154_v1  ;;  %v44_v3 = vld [vmem:[#allocation2 + $0x8] sm:$0xff]  ;;  %v45_v4 = vld [vmem:[#allocation2 + $0x10] sm:$0xff]  ;;  %v46_v6 = vld [vmem:[#allocation2 + $0x18] sm:$0xff] }
  0x27   :  { %961 = vmatprep.subr.bf16.mxu1 %v1152_v0  ;;  %794 = vmatprep.mubr.msk.f32.mxu1 %vm1153_vm0, %v1154_v1  ;;  %v938_v5 = vpack.c.bf16 %v44_v3, %v43_v2  ;;  %v941_v7 = vpack.c.bf16 %v46_v6, %v45_v4  ;;  %v47_v8 = vld [vmem:[#allocation2 + $0x20] sm:$0xff]  ;;  %v48_v9 = vld [vmem:[#allocation2 + $0x28] sm:$0xff]  ;;  %v49_v11 = vld [vmem:[#allocation2 + $0x30] sm:$0xff] }
  0x28   :  { %v944_v10 = vpack.c.bf16 %v48_v9, %v47_v8  ;;  %v50_v12 = vld [vmem:[#allocation2 + $0x38] sm:$0xff]  ;;  %v51_v14 = vld [vmem:[#allocation2 + $0x40] sm:$0xff]  ;;  %v52_v15 = vld [vmem:[#allocation2 + $0x48] sm:$0xff] }
  0x29   :  { %939 = vmatpush3.bf16.msra.mxu0 %v938_v5  ;;  %v947_v13 = vpack.c.bf16 %v50_v12, %v49_v11  ;;  %v950_v16 = vpack.c.bf16 %v52_v15, %v51_v14  ;;  %v53_v17 = vld [vmem:[#allocation2 + $0x50] sm:$0xff]  ;;  %v54_v18 = vld [vmem:[#allocation2 + $0x58] sm:$0xff]  ;;  %v132_v20 = vld [vmem:[#allocation4 + $0x8] sm:$0xff] }
  0x2a   :  { %940 = vmatprep.subr.bf16.mxu0 %v1152_v0  ;;  %v131_v19 = vld [vmem:[#allocation4] sm:$0xff]  ;;  %v133_v21 = vld [vmem:[#allocation4 + $0x10] sm:$0xff]  ;;  %v134_v23 = vld [vmem:[#allocation4 + $0x18] sm:$0xff]  ;;  %v953_v24 = vpack.c.bf16 %v54_v18, %v53_v17 }
  0x2b   :  { %v962_v22 = vpack.c.bf16 %v132_v20, %v131_v19  ;;  %v55_v25 = vld [vmem:[#allocation2 + $0x60] sm:$0xff]  ;;  %v56_v26 = vld [vmem:[#allocation2 + $0x68] sm:$0xff]  ;;  %v965_v27 = vpack.c.bf16 %v134_v23, %v133_v21  ;;  %v135_v28 = vld [vmem:[#allocation4 + $0x20] sm:$0xff] }
  0x2c   :  { %v136_v29 = vld [vmem:[#allocation4 + $0x28] sm:$0xff]  ;;  %v956_v30 = vpack.c.bf16 %v56_v26, %v55_v25  ;;  %v57_v31 = vld [vmem:[#allocation2 + $0x70] sm:$0xff]  ;;  %v58_v32 = vld [vmem:[#allocation2 + $0x78] sm:$0xff] }
  0x2d   :  { %942 = vmatpush3.bf16.msra.mxu0 %v941_v7  ;;  %963 = vmatpush3.bf16.msra.mxu1 %v962_v22  ;;  %v968_v33 = vpack.c.bf16 %v136_v29, %v135_v28  ;;  %v137_v34 = vld [vmem:[#allocation4 + $0x30] sm:$0xff]  ;;  %v138_v35 = vld [vmem:[#allocation4 + $0x38] sm:$0xff]  ;;  %v959_v36 = vpack.c.bf16 %v58_v32, %v57_v31  ;;  %v139_v40 = vld [vmem:[#allocation4 + $0x40] sm:$0xff] }
  0x2e   :  { %943 = vmatprep.subr.bf16.mxu0 %v1152_v0  ;;  %964 = vmatprep.subr.bf16.mxu1 %v1152_v0  ;;  %v231_v37 = vld [vmem:[#allocation2 + $0x88] sm:$0xff]  ;;  %v232_v38 = vld [vmem:[#allocation2 + $0x90] sm:$0xff]  ;;  %v971_v39 = vpack.c.bf16 %v138_v35, %v137_v34  ;;  %v140_v41 = vld [vmem:[#allocation4 + $0x48] sm:$0xff] }
  0x2f   :  { %v42_v42 = vld [vmem:[%s1280_s0] sm:$0xff]  ;;  %v986_v43 = vpack.c.bf16 %v232_v38, %v231_v37  ;;  %v233_v44 = vld [vmem:[#allocation2 + $0x98] sm:$0xff]  ;;  %v974_v46 = vpack.c.bf16 %v140_v41, %v139_v40  ;;  %v141_v47 = vld [vmem:[#allocation4 + $0x50] sm:$0xff] }
  0x30   :  { %v234_v45 = vld [vmem:[#allocation2 + $0xa0] sm:$0xff]  ;;  %v142_v48 = vld [vmem:[#allocation4 + $0x58] sm:$0xff]  ;;  %v235_v50 = vld [vmem:[#allocation2 + $0xa8] sm:$0xff] }
  0x31   :  { %945 = vmatpush3.bf16.msra.mxu0 %v944_v10  ;;  %966 = vmatpush3.bf16.msra.mxu1 %v965_v27  ;;  %v989_v49 = vpack.c.bf16 %v234_v45, %v233_v44  ;;  %v236_v51 = vld [vmem:[#allocation2 + $0xb0] sm:$0xff]  ;;  %v977_v52 = vpack.c.bf16 %v142_v48, %v141_v47  ;;  %v143_v53 = vld [vmem:[#allocation4 + $0x60] sm:$0xff]  ;;  %v144_v54 = vld [vmem:[#allocation4 + $0x68] sm:$0xff] }
  0x32   :  { %946 = vmatprep.subr.bf16.mxu0 %v1152_v0  ;;  %967 = vmatprep.subr.bf16.mxu1 %v1152_v0  ;;  %v992_v55 = vpack.c.bf16 %v236_v51, %v235_v50  ;;  %v237_v56 = vld [vmem:[#allocation2 + $0xb8] sm:$0xff]  ;;  %v238_v57 = vld [vmem:[#allocation2 + $0xc0] sm:$0xff]  ;;  %v980_v58 = vpack.c.bf16 %v144_v54, %v143_v53  ;;  %v239_v60 = vld [vmem:[#allocation2 + $0xc8] sm:$0xff] }
  0x33   :  { %v995_v59 = vpack.c.bf16 %v238_v57, %v237_v56  ;;  %v240_v61 = vld [vmem:[#allocation2 + $0xd0] sm:$0xff]  ;;  %v241_v63 = vld [vmem:[#allocation2 + $0xd8] sm:$0xff]  ;;  %v242_v2 = vld [vmem:[#allocation2 + $0xe0] sm:$0xff] }
  0x34   :  { %v998_v62 = vpack.c.bf16 %v240_v61, %v239_v60  ;;  %v1001_v3 = vpack.c.bf16 %v242_v2, %v241_v63  ;;  %v243_v4 = vld [vmem:[#allocation2 + $0xe8] sm:$0xff]  ;;  %v244_v5 = vld [vmem:[#allocation2 + $0xf0] sm:$0xff]  ;;  %v245_v7 = vld [vmem:[#allocation2 + $0xf8] sm:$0xff] }
  0x35   :  { %948 = vmatpush3.bf16.msra.mxu0 %v947_v13  ;;  %969 = vmatpush3.bf16.msra.mxu1 %v968_v33  ;;  %v1004_v6 = vpack.c.bf16 %v244_v5, %v243_v4  ;;  %v246_v8 = vld [vmem:[#allocation2 + $0x100] sm:$0xff]  ;;  %v423_v10 = vld [vmem:[#allocation2 + $0x110] sm:$0xff]  ;;  %v424_v11 = vld [vmem:[#allocation2 + $0x118] sm:$0xff] }
  0x36   :  { %949 = vmatprep.subr.bf16.mxu0 %v1152_v0  ;;  %970 = vmatprep.subr.bf16.mxu1 %v1152_v0  ;;  %v1007_v9 = vpack.c.bf16 %v246_v8, %v245_v7  ;;  %v620_v12 = vld [vmem:[%s1280_s0 + $0x8] sm:$0xff]  ;;  %v1034_v13 = vpack.c.bf16 %v424_v11, %v423_v10  ;;  %v425_v14 = vld [vmem:[#allocation2 + $0x120] sm:$0xff]  ;;  %v427_v17 = vld [vmem:[#allocation2 + $0x130] sm:$0xff] }
  0x37   :  { %v426_v15 = vld [vmem:[#allocation2 + $0x128] sm:$0xff]  ;;  %v428_v18 = vld [vmem:[#allocation2 + $0x138] sm:$0xff]  ;;  %v429_v20 = vld [vmem:[#allocation2 + $0x140] sm:$0xff] }
  0x38   :  { %v1040_v19 = vpack.c.bf16 %v428_v18, %v427_v17  ;;  %v430_v21 = vld [vmem:[#allocation2 + $0x148] sm:$0xff]  ;;  %v431_v23 = vld [vmem:[#allocation2 + $0x150] sm:$0xff]  ;;  %v433_v26 = vld [vmem:[#allocation2 + $0x160] sm:$0xff] }
  0x39   :  { %951 = vmatpush3.bf16.msra.mxu0 %v950_v16  ;;  %972 = vmatpush3.bf16.msra.mxu1 %v971_v39  ;;  %v1037_v16 = vpack.c.bf16 %v426_v15, %v425_v14  ;;  %v1043_v22 = vpack.c.bf16 %v430_v21, %v429_v20  ;;  %v434_v27 = vld [vmem:[#allocation2 + $0x168] sm:$0xff]  ;;  %v435_v29 = vld [vmem:[#allocation2 + $0x170] sm:$0xff]  ;;  %v437_v32 = vld [vmem:[#allocation2 + $0x180] sm:$0xff] }
  0x3a   :  { %952 = vmatprep.subr.bf16.mxu0 %v1152_v0  ;;  %973 = vmatprep.subr.bf16.mxu1 %v1152_v0  ;;  %v1049_v28 = vpack.c.bf16 %v434_v27, %v433_v26  ;;  %v438_v33 = vld [vmem:[#allocation2 + $0x188] sm:$0xff]  ;;  %v622_v35 = vld [vmem:[%s1280_s0 + $0x10] sm:$0xff]  ;;  %v59_v39 = vld [vmem:[#allocation2 + $0x80] sm:$0xff] }
  0x3b   :  { %v1055_v34 = vpack.c.bf16 %v438_v33, %v437_v32  ;;  %v146_v37 = vld [vmem:[#allocation4 + $0x78] sm:$0xff]  ;;  %v320_v40 = vld [vmem:[#allocation4 + $0x88] sm:$0xff]  ;;  %v321_v41 = vld [vmem:[#allocation4 + $0x90] sm:$0xff] }
  0x3c   :  { %v1010_v45 = vpack.c.bf16 %v321_v41, %v320_v40  ;;  %v322_v47 = vld [vmem:[#allocation4 + $0x98] sm:$0xff]  ;;  %v323_v48 = vld [vmem:[#allocation4 + $0xa0] sm:$0xff]  ;;  %v324_v50 = vld [vmem:[#allocation4 + $0xa8] sm:$0xff] }
  0x3d   :  { %954 = vmatpush3.bf16.msra.mxu0 %v953_v24  ;;  %975 = vmatpush3.bf16.msra.mxu1 %v974_v46  ;;  %v432_v24 = vld [vmem:[#allocation2 + $0x158] sm:$0xff]  ;;  %v325_v51 = vld [vmem:[#allocation4 + $0xb0] sm:$0xff]  ;;  %v326_v53 = vld [vmem:[#allocation4 + $0xb8] sm:$0xff] }
  0x3e   :  { %955 = vmatprep.subr.bf16.mxu0 %v1152_v0  ;;  %976 = vmatprep.subr.bf16.mxu1 %v1152_v0  ;;  %v1046_v25 = vpack.c.bf16 %v432_v24, %v431_v23  ;;  %v327_v54 = vld [vmem:[#allocation4 + $0xc0] sm:$0xff]  ;;  %v328_v56 = vld [vmem:[#allocation4 + $0xc8] sm:$0xff]  ;;  %v329_v57 = vld [vmem:[#allocation4 + $0xd0] sm:$0xff] }
  0x3f   :  { %v331_v60 = vld [vmem:[#allocation4 + $0xe0] sm:$0xff]  ;;  %v333_v63 = vld [vmem:[#allocation4 + $0xf0] sm:$0xff]  ;;  %v513_v8 = vld [vmem:[#allocation4 + $0x118] sm:$0xff] }
  0x40   :  { %v335_v4 = vld [vmem:[#allocation4 + $0x100] sm:$0xff]  ;;  %v247_v5 = vld [vmem:[#allocation2 + $0x108] sm:$0xff]  ;;  %v515_v15 = vld [vmem:[#allocation4 + $0x128] sm:$0xff] }
  0x41   :  { %957 = vmatpush3.bf16.msra.mxu0 %v956_v30  ;;  %978 = vmatpush3.bf16.msra.mxu1 %v977_v52  ;;  %v436_v30 = vld [vmem:[#allocation2 + $0x178] sm:$0xff]  ;;  %v1016_v52 = vpack.c.bf16 %v325_v51, %v324_v50  ;;  %v512_v7 = vld [vmem:[#allocation4 + $0x110] sm:$0xff]  ;;  %v517_v18 = vld [vmem:[#allocation4 + $0x138] sm:$0xff] }
  0x42   :  { %958 = vmatprep.subr.bf16.mxu0 %v1152_v0  ;;  %979 = vmatprep.subr.bf16.mxu1 %v1152_v0  ;;  %v1052_v31 = vpack.c.bf16 %v436_v30, %v435_v29  ;;  %v514_v14 = vld [vmem:[#allocation4 + $0x120] sm:$0xff]  ;;  %v516_v17 = vld [vmem:[#allocation4 + $0x130] sm:$0xff]  ;;  %v519_v21 = vld [vmem:[#allocation4 + $0x148] sm:$0xff] }
  0x43   :  { %v518_v20 = vld [vmem:[#allocation4 + $0x140] sm:$0xff]  ;;  %v520_v23 = vld [vmem:[#allocation4 + $0x150] sm:$0xff]  ;;  %v521_v24 = vld [vmem:[#allocation4 + $0x158] sm:$0xff] }
  0x44   :  { %v523_v26 = vld [vmem:[#allocation4 + $0x168] sm:$0xff]  ;;  %v525_v29 = vld [vmem:[#allocation4 + $0x178] sm:$0xff] }
  0x45   :  { %960 = vmatpush3.bf16.msra.mxu0 %v959_v36  ;;  %981 = vmatpush3.bf16.msra.mxu1 %v980_v58  ;;  %v145_v36 = vld [vmem:[#allocation4 + $0x70] sm:$0xff]  ;;  %v1022_v58 = vpack.c.bf16 %v329_v57, %v328_v56  ;;  %v527_v32 = vld [vmem:[#allocation4 + $0x188] sm:$0xff]  ;;  %v439_v33 = vld [vmem:[#allocation2 + $0x190] sm:$0xff] }
  0x46   :  { %985 = vmatprep.subr.bf16.mxu0 %v1152_v0  ;;  %982 = vmatprep.subr.bf16.mxu1 %v1152_v0  ;;  %v983_v38 = vpack.c.bf16 %v146_v37, %v145_v36 }
  0x48   :  { %760 = vmatmul.mubr.f32.vlgmr.msra.gmra.mrb[0].mxu0 %v42_v42 }
  0x49   :  { %987 = vmatpush3.bf16.msra.mxu0 %v986_v43  ;;  %829 = vmatprep.mubr.msk.f32.mxu0 %vm1153_vm0, %v1154_v1 }
  0x4a   :  { %988 = vmatprep.subr.bf16.mxu0 %v1152_v0  ;;  %984 = vmatpush3.bf16.msra.mxu1 %v983_v38 }
  0x4b   :  { %1009 = vmatprep.subr.bf16.mxu1 %v1152_v0 }
  0x4d   :  { %990 = vmatpush3.bf16.msra.mxu0 %v989_v49  ;;  %v1013_v49 = vpack.c.bf16 %v323_v48, %v322_v47  ;;  %v336_v48 = vld [vmem:[#allocation4 + $0x108] sm:$0xff] }
  0x4e   :  { %991 = vmatprep.subr.bf16.mxu0 %v1152_v0 }
  0x51   :  { %993 = vmatpush3.bf16.msra.mxu0 %v992_v55  ;;  %v1019_v55 = vpack.c.bf16 %v327_v54, %v326_v53 }
  0x52   :  { %994 = vmatprep.subr.bf16.mxu0 %v1152_v0 }
  0x55   :  { %996 = vmatpush3.bf16.msra.mxu0 %v995_v59  ;;  %v330_v59 = vld [vmem:[#allocation4 + $0xd8] sm:$0xff] }
  0x56   :  { %997 = vmatprep.subr.bf16.mxu0 %v1152_v0  ;;  %v1025_v61 = vpack.c.bf16 %v331_v60, %v330_v59  ;;  %v528_v60 = vld [vmem:[#allocation4 + $0x190] sm:$0xff] }
  0x59   :  { %999 = vmatpush3.bf16.msra.mxu0 %v998_v62  ;;  %v332_v62 = vld [vmem:[#allocation4 + $0xe8] sm:$0xff] }
  0x5a   :  { %1000 = vmatprep.subr.bf16.mxu0 %v1152_v0  ;;  %v1028_v2 = vpack.c.bf16 %v333_v63, %v332_v62 }
  0x5d   :  { %1002 = vmatpush3.bf16.msra.mxu0 %v1001_v3  ;;  %v334_v3 = vld [vmem:[#allocation4 + $0xf8] sm:$0xff] }
  0x5e   :  { %1003 = vmatprep.subr.bf16.mxu0 %v1152_v0 }
  0x61   :  { %1005 = vmatpush3.bf16.msra.mxu0 %v1004_v6  ;;  %v1031_v6 = vpack.c.bf16 %v335_v4, %v334_v3 }
  0x62   :  { %1006 = vmatprep.subr.bf16.mxu0 %v1152_v0 }
  0x65   :  { %1008 = vmatpush3.bf16.msra.mxu0 %v1007_v9 }
  0x66   :  { %1033 = vmatprep.subr.bf16.mxu0 %v1152_v0 }
  0x68   :  { %830 = vmatmul.mubr.f32.vlgmr.msra.gmra.mrb[2].mxu0 %v620_v12  ;;  %v1058_v12 = vpack.c.bf16 %v513_v8, %v512_v7 }
  0x69   :  { %1035 = vmatpush3.bf16.msra.mxu0 %v1034_v13  ;;  %899 = vmatprep.mubr.msk.f32.mxu0 %vm1153_vm0, %v1154_v1 }
  0x6a   :  { %1036 = vmatprep.subr.bf16.mxu0 %v1152_v0 }
  0x6d   :  { %1038 = vmatpush3.bf16.msra.mxu0 %v1037_v16  ;;  %v1061_v16 = vpack.c.bf16 %v515_v15, %v514_v14 }
  0x6e   :  { %1039 = vmatprep.subr.bf16.mxu0 %v1152_v0 }
  0x71   :  { %1041 = vmatpush3.bf16.msra.mxu0 %v1040_v19  ;;  %v1064_v19 = vpack.c.bf16 %v517_v18, %v516_v17 }
  0x72   :  { %1042 = vmatprep.subr.bf16.mxu0 %v1152_v0 }
  0x75   :  { %1044 = vmatpush3.bf16.msra.mxu0 %v1043_v22  ;;  %v1067_v22 = vpack.c.bf16 %v519_v21, %v518_v20 }
  0x76   :  { %1045 = vmatprep.subr.bf16.mxu0 %v1152_v0 }
  0x79   :  { %1047 = vmatpush3.bf16.msra.mxu0 %v1046_v25  ;;  %v1070_v25 = vpack.c.bf16 %v521_v24, %v520_v23 }
  0x7a   :  { %1048 = vmatprep.subr.bf16.mxu0 %v1152_v0 }
  0x7d   :  { %1050 = vmatpush3.bf16.msra.mxu0 %v1049_v28  ;;  %v524_v28 = vld [vmem:[#allocation4 + $0x170] sm:$0xff] }
  0x7e   :  { %1051 = vmatprep.subr.bf16.mxu0 %v1152_v0  ;;  %v1076_v30 = vpack.c.bf16 %v525_v29, %v524_v28 }
  0x81   :  { %1053 = vmatpush3.bf16.msra.mxu0 %v1052_v31  ;;  %v526_v31 = vld [vmem:[#allocation4 + $0x180] sm:$0xff] }
  0x82   :  { %1054 = vmatprep.subr.bf16.mxu0 %v1152_v0 }
  0x85   :  { %1056 = vmatpush3.bf16.msra.mxu0 %v1055_v34  ;;  %v1079_v34 = vpack.c.bf16 %v527_v32, %v526_v31 }
  0x88   :  { %900 = vmatmul.mubr.f32.vlgmr.msra.gmra.mrb[4].mxu0 %v622_v35 }
 0x11b   :  { %v126_v42 = vpop.f32.mrb[0].mxu0 }
 0x11c   :  { %v127_v43 = vadd.f32 %v126_v42, %v59_v39  ;;  %v761_v44 = vpop.f32.mrb[1].mxu0  ;;  %v147_v39 = vld [vmem:[#allocation4 + $0x80] sm:$0xff] }
 0x11e   :  { %v130_v46 = vmax.f32 %v127_v43, 0.0 }
 0x120   :  { %795 = vmatmul.mubr.f32.vlgmr.msra.gmra.mrb[0].mxu1 %v130_v46 }
 0x121   :  { %1011 = vmatpush3.bf16.msra.mxu1 %v1010_v45  ;;  %864 = vmatprep.mubr.msk.f32.mxu1 %vm1153_vm0, %v1154_v1 }
 0x122   :  { %1012 = vmatprep.subr.bf16.mxu1 %v1152_v0 }
 0x125   :  { %1014 = vmatpush3.bf16.msra.mxu1 %v1013_v49 }
 0x126   :  { %1015 = vmatprep.subr.bf16.mxu1 %v1152_v0 }
 0x129   :  { %1017 = vmatpush3.bf16.msra.mxu1 %v1016_v52 }
 0x12a   :  { %1018 = vmatprep.subr.bf16.mxu1 %v1152_v0 }
 0x12d   :  { %1020 = vmatpush3.bf16.msra.mxu1 %v1019_v55 }
 0x12e   :  { %1021 = vmatprep.subr.bf16.mxu1 %v1152_v0 }
 0x131   :  { %1023 = vmatpush3.bf16.msra.mxu1 %v1022_v58 }
 0x132   :  { %1024 = vmatprep.subr.bf16.mxu1 %v1152_v0 }
 0x135   :  { %1026 = vmatpush3.bf16.msra.mxu1 %v1025_v61 }
 0x136   :  { %1027 = vmatprep.subr.bf16.mxu1 %v1152_v0 }
 0x139   :  { %1029 = vmatpush3.bf16.msra.mxu1 %v1028_v2 }
 0x13a   :  { %1030 = vmatprep.subr.bf16.mxu1 %v1152_v0 }
 0x13b   :  { %v314_v9 = vpop.f32.mrb[2].mxu0 }
 0x13c   :  { %v315_v10 = vadd.f32 %v314_v9, %v247_v5  ;;  %v831_v11 = vpop.f32.mrb[3].mxu0 }
 0x13d   :  { %1032 = vmatpush3.bf16.msra.mxu1 %v1031_v6 }
 0x13e   :  { %v318_v13 = vmax.f32 %v315_v10, 0.0  ;;  %1057 = vmatprep.subr.bf16.mxu1 %v1152_v0 }
 0x140   :  { %865 = vmatmul.mubr.f32.vlgmr.msra.gmra.mrb[2].mxu1 %v318_v13 }
 0x141   :  { %1059 = vmatpush3.bf16.msra.mxu1 %v1058_v12  ;;  %934 = vmatprep.mubr.msk.f32.mxu1 %vm1153_vm0, %v1154_v1  ;;  %v522_v1 = vld [vmem:[#allocation4 + $0x160] sm:$0xff] }
 0x142   :  { %1060 = vmatprep.subr.bf16.mxu1 %v1152_v0  ;;  %v1073_v27 = vpack.c.bf16 %v523_v26, %v522_v1 }
 0x145   :  { %1062 = vmatpush3.bf16.msra.mxu1 %v1061_v16 }
 0x146   :  { %1063 = vmatprep.subr.bf16.mxu1 %v1152_v0 }
 0x149   :  { %1065 = vmatpush3.bf16.msra.mxu1 %v1064_v19 }
 0x14a   :  { %1066 = vmatprep.subr.bf16.mxu1 %v1152_v0 }
 0x14d   :  { %1068 = vmatpush3.bf16.msra.mxu1 %v1067_v22 }
 0x14e   :  { %1069 = vmatprep.subr.bf16.mxu1 %v1152_v0 }
 0x151   :  { %1071 = vmatpush3.bf16.msra.mxu1 %v1070_v25 }
 0x152   :  { %1072 = vmatprep.subr.bf16.mxu1 %v1152_v0 }
 0x155   :  { %1074 = vmatpush3.bf16.msra.mxu1 %v1073_v27 }
 0x156   :  { %1075 = vmatprep.subr.bf16.mxu1 %v1152_v0 }
 0x159   :  { %1077 = vmatpush3.bf16.msra.mxu1 %v1076_v30 }
 0x15a   :  { %1078 = vmatprep.subr.bf16.mxu1 %v1152_v0 }
 0x15b   :  { %v506_v35 = vpop.f32.mrb[4].mxu0 }
 0x15c   :  { %v507_v36 = vadd.f32 %v506_v35, %v439_v33  ;;  %v901_v37 = vpop.f32.mrb[5].mxu0 }
 0x15d   :  { %1080 = vmatpush3.bf16.msra.mxu1 %v1079_v34 }
 0x15e   :  { %v510_v38 = vmax.f32 %v507_v36, 0.0 }
 0x160   :  { %935 = vmatmul.mubr.f32.vlgmr.msra.gmra.mrb[4].mxu1 %v510_v38 }
 0x1f3   :  { %v214_v40 = vpop.f32.mrb[0].mxu1 }
 0x1f4   :  { %v215_v41 = vadd.f32 %v214_v40, %v147_v39  ;;  %v796_v42 = vpop.f32.mrb[1].mxu1 }
 0x1f6   :  { %v219_v43 = vand.u32 2147483647, %v215_v41  ;;  %v218_v50 = vmax.f32 %v215_v41, 0.0 }
 0x1f8   :  { %v220_v44 = vsub.f32 0.0, %v219_v43 }
 0x1fa   :  { %v221_v45 = vmul.f32 1.442695, %v220_v44 }
 0x1fc   :  { %1088 = vpow2.f32 %v221_v45 }
 0x206   :  { %v1089_v46 = vpop.eup %1088 }
 0x207   :  { %v223_v47 = vadd.f32 1.0, %v1089_v46 }
 0x209   :  { %1090 = vlog2.f32 %v223_v47 }
 0x213   :  { %v1091_v49 = vpop.eup %1090  ;;  %v403_v0 = vpop.f32.mrb[2].mxu1 }
 0x214   :  { %v225_v51 = vmul.f32 0.6931472, %v1091_v49  ;;  %v404_v52 = vadd.f32 %v403_v0, %v336_v48  ;;  %v866_v53 = vpop.f32.mrb[3].mxu1 }
 0x216   :  { %v226_v54 = vadd.f32 %v225_v51, %v218_v50  ;;  %v408_v55 = vand.u32 2147483647, %v404_v52  ;;  %v407_v63 = vmax.f32 %v404_v52, 0.0 }
 0x218   :  { %227 = vst [vmem:[%s1283_s3] sm:$0xff] %v226_v54  ;;  %v409_v56 = vsub.f32 0.0, %v408_v55 }
 0x21a   :  { %v410_v57 = vmul.f32 1.442695, %v409_v56 }
 0x21c   :  { %1092 = vpow2.f32 %v410_v57 }
 0x226   :  { %v1093_v58 = vpop.eup %1092 }
 0x227   :  { %v412_v59 = vadd.f32 1.0, %v1093_v58 }
 0x229   :  { %1094 = vlog2.f32 %v412_v59 }
 0x233   :  { %v1095_v61 = vpop.eup %1094  ;;  %v595_v62 = vpop.f32.mrb[4].mxu1 }
 0x234   :  { %v414_v2 = vmul.f32 0.6931472, %v1095_v61  ;;  %v596_v3 = vadd.f32 %v595_v62, %v528_v60  ;;  %v936_v4 = vpop.f32.mrb[5].mxu1 }
 0x236   :  { %v415_v5 = vadd.f32 %v414_v2, %v407_v63  ;;  %v600_v6 = vand.u32 2147483647, %v596_v3  ;;  %v599_v13 = vmax.f32 %v596_v3, 0.0 }
 0x238   :  { %621 = vst [vmem:[%s1283_s3 + $0x8] sm:$0xff] %v415_v5  ;;  %v418_v7 = vadd.f32 %v415_v5, %v226_v54  ;;  %v601_v8 = vsub.f32 0.0, %v600_v6 }
 0x23a   :  { %v602_v9 = vmul.f32 1.442695, %v601_v8  ;;  %v419_v15 = vmul.f32 0.5, %v418_v7 }
 0x23c   :  { %1096 = vpow2.f32 %v602_v9 }
 0x246   :  { %v1097_v10 = vpop.eup %1096 }
 0x247   :  { %v604_v11 = vadd.f32 1.0, %v1097_v10 }
 0x249   :  { %1098 = vlog2.f32 %v604_v11 }
 0x253   :  { %v1099_v12 = vpop.eup %1098 }
 0x254   :  { %v606_v14 = vmul.f32 0.6931472, %v1099_v12 }
 0x256   :  { %v607_v16 = vadd.f32 %v606_v14, %v599_v13 }
 0x258   :  { %623 = vst [vmem:[%s1283_s3 + $0x10] sm:$0xff] %v607_v16  ;;  %v610_v17 = vadd.f32 %v607_v16, %v419_v15 }
 0x25a   :  { %v611_v18 = vmul.f32 0.5, %v610_v17 }
 0x25c   :  { %624 = vst [vmem:[%s1283_s3 + $0x18] sm:$0xff] %v611_v18 }
 0x25d   :  { %618 = vsyncpa [#allocation3], 1 }
 0x25e   :  { %619 = vsyncpa [#allocation5], 1 }

</bundles_post_ra>
